<compile_context>
chip_gen: v5e
topology: v5e:2x2
jax: 0.10.0
libtpu: 0.0.40
codegen_flags: <defaults>
</compile_context>

<pallas_src>
import math
import jax
import jax.numpy as jnp
from jax.experimental import pallas as pl
from jax.experimental.pallas import tpu as pltpu


def _round_up(x, m):
    return (x + m - 1) // m * m


def _vmem_capacity_bytes():
    try:
        return int(pltpu.get_tpu_info().vmem_capacity_bytes)
    except Exception:
        return 64 * 1024 * 1024  # conservative fallback (v7x per-TC VMEM)


def make_taylor_net(weight1, weight2=None, bias=None, *,
                    tm_max=512, tn_max=512, weight_dtype=None):
    """Build a jitted TaylorNet forward from PyTorch-layout parameters.

    weight1/weight2: (out_features, in_features); bias: (out_features,) or None.
    Weight transpose / padding / stacking happens once here, not per call.
    If weight_dtype is given (e.g. jnp.bfloat16), x is cast to that dtype for
    the MXU matmul (f32 accumulation) -- slightly different numerics.
    Returns apply(x) supporting x of shape (..., in_features).
    """
    weight1 = jnp.asarray(weight1)
    out_f, in_f = weight1.shape
    has_w2 = weight2 is not None
    has_b = bias is not None
    if has_w2:
        weight2 = jnp.asarray(weight2)
        assert weight2.shape == (out_f, in_f)
    else:
        assert in_f == out_f, "no-weight2 path requires in_features == out_features"

    cast_inputs = weight_dtype is not None
    if cast_inputs:
        weight1 = weight1.astype(weight_dtype)
        if has_w2:
            weight2 = weight2.astype(weight_dtype)
    w_item = weight1.dtype.itemsize

    # ---- lane-dense output tiling (multiples of 128) ----
    out_p = _round_up(out_f, 128)
    # Feature dim seen by the kernel: on the no-W2 path the elementwise factor
    # is x itself, so pad x's feature dim to the padded output width.
    in_dim = in_f if has_w2 else out_p
    stripe_mult = 2 if has_w2 else 1

    # Widened tn candidate set: all multiples of 128 <= tn_max that divide
    # out_p, largest first, with the double-buffered weight stripe kept inside
    # ~half of a conservative (v7x) VMEM budget.
    tn_cap = max(128, (min(tn_max, out_p) // 128) * 128)
    tn = 128
    for cand in range(tn_cap, 127, -128):
        if out_p % cand:
            continue
        stripe = in_dim * stripe_mult * cand * w_item
        if 2 * stripe <= 22 * 1024 * 1024 or cand == 128:
            tn = cand
            break
    num_j = out_p // tn

    # ---- prepare weights once: transpose, pad, stack per output-column stripe ----
    w1t = jnp.pad(weight1.T, ((0, in_dim - in_f), (0, out_p - out_f)))
    w1s = w1t.reshape(in_dim, num_j, tn).transpose(1, 0, 2)        # (num_j, in_dim, tn)
    if has_w2:
        w2t = jnp.pad(weight2.T, ((0, in_dim - in_f), (0, out_p - out_f)))
        w2s = w2t.reshape(in_dim, num_j, tn).transpose(1, 0, 2)
        wstk = jnp.concatenate([w1s, w2s], axis=-1)                # (num_j, in_dim, 2*tn)
    else:
        wstk = w1s                                                 # (num_j, in_dim, tn)
    w_width = wstk.shape[-1]
    wbytes = in_dim * w_width * wstk.dtype.itemsize                # one stripe
    wdt = wstk.dtype

    if has_b:
        b2d = jnp.pad(jnp.asarray(bias).astype(jnp.float32).reshape(1, out_f),
                      ((0, 0), (0, out_p - out_f)))                # (1, out_p)
    else:
        b2d = None

    # ---- generation-aware tile sizing / VMEM limit ----
    def _tiles_and_limit(n_rows, x_itemsize):
        nb = max(int(x_itemsize), 1)
        pack = max(8, 32 // nb)          # sublane packing: 8 f32, 16 bf16, 32 int8
        vmem_cap = _vmem_capacity_bytes()
        budget = int(0.70 * vmem_cap)
        limit_cap = max(32 << 20, min(int(0.80 * vmem_cap), vmem_cap - (8 << 20)))

        tm = min(tm_max, _round_up(max(n_rows, 1), pack))

        def footprint(tm_):
            xf = tm_ * in_dim * nb                       # full-feature x tile
            of = tm_ * tn * nb                           # output tile
            bf = tn * 4 if has_b else 0
            dbuf = 2 * (xf + of + bf + wbytes)           # double-buffered streams
            f32_tmp = tm_ * w_width * 4 + 2 * tm_ * tn * 4   # matmul result + wx/q/y
            return dbuf + f32_tmp

        while footprint(tm) > budget and tm > pack:
            tm = max(pack, (tm // 2) // pack * pack)

        limit = int(footprint(tm) * 1.25) + (8 << 20)
        limit = min(max(limit, 32 << 20), limit_cap)
        return tm, limit, pack

    # ---- kernel factory (j_axis = grid axis that indexes output-column stripes) ----
    def _make_kernel(j_axis):
        if has_w2:
            if has_b:
                def kernel(x_ref, w_ref, b_ref, o_ref):
                    x = x_ref[...]
                    if cast_inputs:
                        x = x.astype(wdt)
                    res = jnp.dot(x, w_ref[0], preferred_element_type=jnp.float32)
                    wx, q = res[:, :tn], res[:, tn:]
                    o_ref[...] = (q * wx + wx + b_ref[...]).astype(o_ref.dtype)
            else:
                def kernel(x_ref, w_ref, o_ref):
                    x = x_ref[...]
                    if cast_inputs:
                        x = x.astype(wdt)
                    res = jnp.dot(x, w_ref[0], preferred_element_type=jnp.float32)
                    wx, q = res[:, :tn], res[:, tn:]
                    o_ref[...] = (q * wx + wx).astype(o_ref.dtype)
        else:
            def _q(x_ref, x_loaded):
                # Elementwise factor: lane-aligned slice of the resident x tile
                # (no extra HBM DMA).
                if num_j == 1:
                    return x_loaded.astype(jnp.float32)
                off = pl.multiple_of(pl.program_id(j_axis) * tn, 128)
                return x_ref[:, pl.ds(off, tn)].astype(jnp.float32)

            if has_b:
                def kernel(x_ref, w_ref, b_ref, o_ref):
                    x = x_ref[...]
                    xd = x.astype(wdt) if cast_inputs else x
                    wx = jnp.dot(xd, w_ref[0], preferred_element_type=jnp.float32)
                    q = _q(x_ref, x)
                    o_ref[...] = (q * wx + wx + b_ref[...]).astype(o_ref.dtype)
            else:
                def kernel(x_ref, w_ref, o_ref):
                    x = x_ref[...]
                    xd = x.astype(wdt) if cast_inputs else x
                    wx = jnp.dot(xd, w_ref[0], preferred_element_type=jnp.float32)
                    q = _q(x_ref, x)
                    o_ref[...] = (q * wx + wx).astype(o_ref.dtype)
        return kernel

    def apply(x):
        orig_shape = x.shape
        assert orig_shape[-1] == in_f, "last dim must be in_features"
        x2d = x.reshape(-1, in_f)
        n_rows = x2d.shape[0]
        nb = x2d.dtype.itemsize

        tm, vmem_limit, pack = _tiles_and_limit(n_rows, nb)
        # Avoid row padding (and the post-kernel slice copy) when a nearby tile
        # size divides n_rows exactly.
        if n_rows > tm and n_rows % tm:
            for d in range(tm, max(tm // 2, pack) - 1, -pack):
                if n_rows % d == 0:
                    tm = d
                    break
        n_pad = _round_up(n_rows, tm)
        num_i = n_pad // tm

        pad_r = n_pad - n_rows
        pad_c = in_dim - in_f
        if pad_r or pad_c:
            x2d = jnp.pad(x2d, ((0, pad_r), (0, pad_c)))

        # ---- traffic-driven grid order ----
        x_bytes = n_pad * in_dim * nb
        w_total = num_j * wbytes
        j_outer = (num_j > 1 and num_i > 1 and
                   num_j * x_bytes + w_total < x_bytes + num_i * w_total)

        if j_outer:
            # column stripes outer (weights DMA'd once), rows stream inner.
            grid = (num_j, num_i)
            x_map = lambda j, i: (i, 0)
            w_map = lambda j, i: (j, 0, 0)
            b_map = lambda j, i: (0, j)
            o_map = lambda j, i: (i, j)
            j_axis = 0
        else:
            # rows outer (x DMA'd once), column stripes inner.
            grid = (num_i, num_j)
            x_map = lambda i, j: (i, 0)
            w_map = lambda i, j: (j, 0, 0)
            b_map = lambda i, j: (0, j)
            o_map = lambda i, j: (i, j)
            j_axis = 1
        # Outer axis "parallel" (megacore split lands there), inner "arbitrary"
        # so the split never multiplies the dominant HBM stream.
        dims = ("parallel", "arbitrary")

        in_specs = [pl.BlockSpec((tm, in_dim), x_map),
                    pl.BlockSpec((1, in_dim, w_width), w_map)]
        args = [x2d, wstk]
        if has_b:
            in_specs.append(pl.BlockSpec((1, tn), b_map))
            args.append(b2d)

        out = pl.pallas_call(
            _make_kernel(j_axis),
            out_shape=jax.ShapeDtypeStruct((n_pad, out_p), x.dtype),
            grid_spec=pltpu.PrefetchScalarGridSpec(
                num_scalar_prefetch=0,
                grid=grid,
                in_specs=in_specs,
                out_specs=pl.BlockSpec((tm, tn), o_map),
            ),
            compiler_params=pltpu.CompilerParams(
                dimension_semantics=dims,
                vmem_limit_bytes=vmem_limit,
            ),
        )(*args)

        if n_pad != n_rows or out_p != out_f:
            out = out[:n_rows, :out_f]
        return out.reshape(*orig_shape[:-1], out_f)

    return jax.jit(apply)


def taylor_net_forward(x, weight1, weight2=None, bias=None, **kw):
    """One-shot convenience wrapper (prefer make_taylor_net for repeated calls)."""
    return make_taylor_net(weight1, weight2, bias, **kw)(x)


def _xavier_normal(key, out_f, in_f):
    std = math.sqrt(2.0 / (in_f + out_f))
    return std * jax.random.normal(key, (out_f, in_f), dtype=jnp.float32)


def _reference(x, w1, w2, b):
    wx = x @ w1.T
    q = x @ w2.T if w2 is not None else x
    y = q * wx + wx
    if b is not None:
        y = y + b
    return y


if __name__ == "__main__":
    key = jax.random.PRNGKey(0)
    k1, k2, k3, k4, k5, k6 = jax.random.split(key, 6)

    # ---- Case 1: in_features != out_features (W2 path), with bias ----
    N, in_f, out_f = 128, 32, 64
    x = jax.random.normal(k1, (N, in_f), dtype=jnp.float32)
    w1 = _xavier_normal(k2, out_f, in_f)
    w2 = _xavier_normal(k3, out_f, in_f)
    stdv = 1.0 / math.sqrt(in_f)
    b = jax.random.uniform(k4, (out_f,), minval=-stdv, maxval=stdv, dtype=jnp.float32)

    fwd1 = make_taylor_net(w1, w2, b)
    y = jax.block_until_ready(fwd1(x))
    y_ref = _reference(x, w1, w2, b)
    assert y.shape == y_ref.shape
    assert jnp.allclose(y, y_ref, atol=2e-4, rtol=2e-4), "mismatch (w2 path)"

    # ---- Case 2: in_features == out_features (no W2), no bias, extra leading dims ----
    in_f2 = out_f2 = 32
    x2 = jax.random.normal(k5, (2, 8, in_f2), dtype=jnp.float32)
    w1b = _xavier_normal(k6, out_f2, in_f2)

    fwd2 = make_taylor_net(w1b, None, None)
    y2 = jax.block_until_ready(fwd2(x2))
    y2_ref = _reference(x2, w1b, None, None)
    assert y2.shape == y2_ref.shape
    assert jnp.allclose(y2, y2_ref, atol=2e-4, rtol=2e-4), "mismatch (no-w2 path)"

    print("KERNEL_OK")
</pallas_src>

<mosaic_0001>
module attributes {stable_mosaic.version = 11 : i64} {
  func.func @kernel(%arg0: i32, %arg1: i32, %arg2: memref<128x32xf32, #tpu.memory_space<vmem>>, %arg3: memref<1x32x256xf32, #tpu.memory_space<vmem>>, %arg4: memref<1x128xf32, #tpu.memory_space<vmem>>, %arg5: memref<128x128xf32, #tpu.memory_space<vmem>>) attributes {dimension_semantics = [#tpu.dimension_semantics<parallel>, #tpu.dimension_semantics<arbitrary>], iteration_bounds = array<i64: 1, 1>, scalar_prefetch = 0 : i64, scratch_operands = 0 : i64, tpu.core_type = #tpu.core_type<tc>, window_params = [{transform_indices = @transform_0, window_bounds = array<i64: 128, 32>}, {transform_indices = @transform_1, window_bounds = array<i64: 1, 32, 256>}, {transform_indices = @transform_2, window_bounds = array<i64: 1, 128>}, {transform_indices = @transform_3, window_bounds = array<i64: 128, 128>}]} {
    %c0 = arith.constant 0 : index
    %c0_0 = arith.constant 0 : index
    %0 = vector.load %arg2[%c0, %c0_0] : memref<128x32xf32, #tpu.memory_space<vmem>>, vector<128x32xf32>
    %c0_1 = arith.constant 0 : index
    %c0_2 = arith.constant 0 : index
    %c0_3 = arith.constant 0 : index
    %1 = vector.load %arg3[%c0_1, %c0_2, %c0_3] : memref<1x32x256xf32, #tpu.memory_space<vmem>>, vector<1x32x256xf32>
    %2 = vector.shape_cast %1 : vector<1x32x256xf32> to vector<32x256xf32>
    %cst = arith.constant dense<0.000000e+00> : vector<128x256xf32>
    %3 = tpu.matmul %0, %2, %cst {dimension_numbers = #tpu.dot_dimension_numbers<[1], [0], [0], [1], [0, 0, 1, 1], [], []>} : vector<128x32xf32>, vector<32x256xf32>, vector<128x256xf32> -> vector<128x256xf32>
    %4 = vector.extract_strided_slice %3 {offsets = [0, 0], sizes = [128, 128], strides = [1, 1]} : vector<128x256xf32> to vector<128x128xf32>
    %5 = vector.extract_strided_slice %3 {offsets = [0, 128], sizes = [128, 128], strides = [1, 1]} : vector<128x256xf32> to vector<128x128xf32>
    %6 = arith.mulf %5, %4 : vector<128x128xf32>
    %7 = arith.addf %6, %4 : vector<128x128xf32>
    %c0_4 = arith.constant 0 : index
    %c0_5 = arith.constant 0 : index
    %8 = vector.load %arg4[%c0_4, %c0_5] : memref<1x128xf32, #tpu.memory_space<vmem>>, vector<1x128xf32>
    %9 = vector.broadcast %8 : vector<1x128xf32> to vector<128x128xf32>
    %10 = arith.addf %7, %9 : vector<128x128xf32>
    %c0_6 = arith.constant 0 : index
    %c0_7 = arith.constant 0 : index
    %11 = vector.load %arg5[%c0_6, %c0_7] : memref<128x128xf32, #tpu.memory_space<vmem>>, vector<128x128xf32>
    tpu.vector_store %arg5[%c0_6, %c0_7], %10 {strides = array<i32>} : memref<128x128xf32, #tpu.memory_space<vmem>>, vector<128x128xf32>,
    return
  }
  func.func @transform_0(%arg0: i32, %arg1: i32) -> (i32, i32) {
    %c0_i32 = arith.constant 0 : i32
    %c0_i32_0 = arith.constant 0 : i32
    return %arg0, %c0_i32 : i32, i32
  }
  func.func @transform_1(%arg0: i32, %arg1: i32) -> (i32, i32, i32) {
    %c0_i32 = arith.constant 0 : i32
    %c0_i32_0 = arith.constant 0 : i32
    %c0_i32_1 = arith.constant 0 : i32
    return %arg1, %c0_i32, %c0_i32_0 : i32, i32, i32
  }
  func.func @transform_2(%arg0: i32, %arg1: i32) -> (i32, i32) {
    %c0_i32 = arith.constant 0 : i32
    %c0_i32_0 = arith.constant 0 : i32
    return %c0_i32, %arg1 : i32, i32
  }
  func.func @transform_3(%arg0: i32, %arg1: i32) -> (i32, i32) {
    %c0_i32 = arith.constant 0 : i32
    return %arg0, %arg1 : i32, i32
  }
}

</mosaic_0001>

<bundles_post_ra>
// kernel: apply.1
= control target key start
LH: loop header
LB: loop body
LE: loop exit
PB: predicated region body
PF: predicated region fallthrough
CT: control target
= control target key end

     0   :  { %vm38_vm0 = vcmask 261120   ;;  %s523_s1 = inlined_call_operand.vmem [shape: f32[1,32,256], index: 1, kind: input, shape index: {}]   ;;  %s524_s0 = inlined_call_operand.vmem [shape: f32[128,32], index: 0, kind: input, shape index: {}]   ;;  %s525_s2 = inlined_call_operand.vmem [shape: f32[1,128], index: 2, kind: input, shape index: {}]   ;;  %s526_s3 = inlined_call_operand.vmem [shape: f32[128,128], index: 3, kind: output, shape index: {}]  }
   0x1   :  { %v36_v0 = vld [vmem:[%s523_s1 + $0x30] sm:$0xff]  ;;  %v37_v1 = vld [vmem:[%s523_s1 + $0x38] sm:$0xff]  ;;  %v34_v2 = vld [vmem:[%s523_s1 + $0x20] sm:$0xff] }
   0x2   :  { %321 = vmatpush.msra.mxu2 %v36_v0  ;;  %325 = vmatpush.msra.mxu3 %v37_v1  ;;  %v35_v3 = vld [vmem:[%s523_s1 + $0x28] sm:$0xff]  ;;  %v32_v4 = vld [vmem:[%s523_s1 + $0x10] sm:$0xff]  ;;  %v33_v5 = vld [vmem:[%s523_s1 + $0x18] sm:$0xff] }
   0x3   :  { %99 = vmatpush.msra.mxu0 %v36_v0  ;;  %164 = vmatpush.msra.mxu1 %v37_v1  ;;  %v30_v6 = vld [vmem:[%s523_s1] sm:$0xff]  ;;  %v31_v7 = vld [vmem:[%s523_s1 + $0x8] sm:$0xff]  ;;  %v24_v12 = vld [vmem:[%s524_s0 + $0x50] sm:$0xff] }
   0x4   :  { %322 = vmatpush.msra.mxu2 %v34_v2  ;;  %326 = vmatpush.msra.mxu3 %v35_v3  ;;  %v22_v8 = vld [vmem:[%s524_s0 + $0x40] sm:$0xff]  ;;  %v23_v10 = vld [vmem:[%s524_s0 + $0x48] sm:$0xff]  ;;  %v16_v13 = vld [vmem:[%s524_s0 + $0x10] sm:$0xff] }
   0x5   :  { %100 = vmatpush.msra.mxu0 %v34_v2  ;;  %165 = vmatpush.msra.mxu1 %v35_v3  ;;  %v14_v9 = vld [vmem:[%s524_s0] sm:$0xff]  ;;  %v15_v11 = vld [vmem:[%s524_s0 + $0x8] sm:$0xff]  ;;  %v25_v14 = vld [vmem:[%s524_s0 + $0x58] sm:$0xff] }
   0x6   :  { %323 = vmatpush.msra.mxu2 %v32_v4  ;;  %327 = vmatpush.msra.mxu3 %v33_v5  ;;  %v17_v15 = vld [vmem:[%s524_s0 + $0x18] sm:$0xff]  ;;  %v26_v16 = vld [vmem:[%s524_s0 + $0x60] sm:$0xff]  ;;  %v27_v18 = vld [vmem:[%s524_s0 + $0x68] sm:$0xff] }
   0x7   :  { %101 = vmatpush.msra.mxu0 %v32_v4  ;;  %166 = vmatpush.msra.mxu1 %v33_v5  ;;  %v18_v17 = vld [vmem:[%s524_s0 + $0x20] sm:$0xff]  ;;  %v19_v19 = vld [vmem:[%s524_s0 + $0x28] sm:$0xff]  ;;  %v28_v20 = vld [vmem:[%s524_s0 + $0x70] sm:$0xff] }
   0x8   :  { %324 = vmatpush.msra.mxu2 %v30_v6  ;;  %328 = vmatpush.msra.mxu3 %v31_v7  ;;  %v20_v21 = vld [vmem:[%s524_s0 + $0x30] sm:$0xff]  ;;  %v29_v22 = vld [vmem:[%s524_s0 + $0x78] sm:$0xff]  ;;  %v457_v27 = vld [vmem:[%s525_s2] ss:$0 sm:$0xff] }
   0x9   :  { %297 = vmatmul.msk.f32.vlgmr.msra.gmra.mxu2 %vm38_vm0, %v22_v8  ;;  %313 = vmatmul.msk.f32.vlgmr.msra.gmra.mxu3 %vm38_vm0, %v22_v8  ;;  %v21_v23 = vld [vmem:[%s524_s0 + $0x38] sm:$0xff] }
   0xa   :  { %102 = vmatpush.msra.mxu0 %v30_v6  ;;  %167 = vmatpush.msra.mxu1 %v31_v7 }
   0xb   :  { %289 = vmatmul.msk.f32.vlgmr.msra.gmra.mxu0 %vm38_vm0, %v14_v9  ;;  %305 = vmatmul.msk.f32.vlgmr.msra.gmra.mxu1 %vm38_vm0, %v14_v9 }
  0x11   :  { %298 = vmatmul.msk.f32.gmra.mxu2 %vm38_vm0, %v23_v10  ;;  %314 = vmatmul.msk.f32.gmra.mxu3 %vm38_vm0, %v23_v10 }
  0x13   :  { %290 = vmatmul.msk.f32.gmra.mxu0 %vm38_vm0, %v15_v11  ;;  %306 = vmatmul.msk.f32.gmra.mxu1 %vm38_vm0, %v15_v11 }
  0x19   :  { %299 = vmatmul.msk.f32.gmra.mxu2 %vm38_vm0, %v24_v12  ;;  %315 = vmatmul.msk.f32.gmra.mxu3 %vm38_vm0, %v24_v12 }
  0x1b   :  { %291 = vmatmul.msk.f32.gmra.mxu0 %vm38_vm0, %v16_v13  ;;  %307 = vmatmul.msk.f32.gmra.mxu1 %vm38_vm0, %v16_v13 }
  0x21   :  { %300 = vmatmul.msk.f32.gmra.mxu2 %vm38_vm0, %v25_v14  ;;  %316 = vmatmul.msk.f32.gmra.mxu3 %vm38_vm0, %v25_v14 }
  0x23   :  { %292 = vmatmul.msk.f32.gmra.mxu0 %vm38_vm0, %v17_v15  ;;  %308 = vmatmul.msk.f32.gmra.mxu1 %vm38_vm0, %v17_v15 }
  0x29   :  { %301 = vmatmul.msk.f32.gmra.mxu2 %vm38_vm0, %v26_v16  ;;  %317 = vmatmul.msk.f32.gmra.mxu3 %vm38_vm0, %v26_v16 }
  0x2b   :  { %293 = vmatmul.msk.f32.gmra.mxu0 %vm38_vm0, %v18_v17  ;;  %309 = vmatmul.msk.f32.gmra.mxu1 %vm38_vm0, %v18_v17 }
  0x31   :  { %302 = vmatmul.msk.f32.gmra.mxu2 %vm38_vm0, %v27_v18  ;;  %318 = vmatmul.msk.f32.gmra.mxu3 %vm38_vm0, %v27_v18 }
  0x33   :  { %294 = vmatmul.msk.f32.gmra.mxu0 %vm38_vm0, %v19_v19  ;;  %310 = vmatmul.msk.f32.gmra.mxu1 %vm38_vm0, %v19_v19 }
  0x39   :  { %303 = vmatmul.msk.f32.gmra.mxu2 %vm38_vm0, %v28_v20  ;;  %319 = vmatmul.msk.f32.gmra.mxu3 %vm38_vm0, %v28_v20 }
  0x3b   :  { %295 = vmatmul.msk.f32.gmra.mxu0 %vm38_vm0, %v20_v21  ;;  %311 = vmatmul.msk.f32.gmra.mxu1 %vm38_vm0, %v20_v21 }
  0x41   :  { %304 = vmatmul.msk.f32.gmra.mxu2 %vm38_vm0, %v29_v22  ;;  %320 = vmatmul.msk.f32.gmra.mxu3 %vm38_vm0, %v29_v22 }
  0x43   :  { %296 = vmatmul.msk.f32.gmra.mxu0 %vm38_vm0, %v21_v23  ;;  %312 = vmatmul.msk.f32.gmra.mxu1 %vm38_vm0, %v21_v23 }
  0x88   :  { %v104_v24 = vpop.f32.mrf.mxu0  ;;  %v169_v25 = vpop.f32.mrf.mxu1 }
  0x89   :  { %v217_v26 = vmul.f32 %v169_v25, %v104_v24 }
  0x8b   :  { %v233_v28 = vadd.f32 %v217_v26, %v104_v24 }
  0x8c   :  { %v128_v29 = vpop.f32.mrf.mxu2  ;;  %v193_v30 = vpop.f32.mrf.mxu3 }
  0x8d   :  { %v253_v31 = vadd.f32 %v457_v27, %v233_v28  ;;  %v225_v32 = vmul.f32 %v193_v30, %v128_v29 }
  0x8f   :  { %269 = vst [vmem:[%s526_s3] sm:$0xff] %v253_v31  ;;  %v241_v33 = vadd.f32 %v225_v32, %v128_v29 }
  0x90   :  { %v107_v34 = vpop.f32.mrf.mxu0  ;;  %v172_v35 = vpop.f32.mrf.mxu1 }
  0x91   :  { %v261_v36 = vadd.f32 %v457_v27, %v241_v33  ;;  %v218_v37 = vmul.f32 %v172_v35, %v107_v34 }
  0x93   :  { %277 = vst [vmem:[%s526_s3 + $0x40] sm:$0xff] %v261_v36  ;;  %v234_v38 = vadd.f32 %v218_v37, %v107_v34 }
  0x94   :  { %v131_v39 = vpop.f32.mrf.mxu2  ;;  %v196_v40 = vpop.f32.mrf.mxu3 }
  0x95   :  { %v254_v41 = vadd.f32 %v457_v27, %v234_v38  ;;  %v226_v42 = vmul.f32 %v196_v40, %v131_v39 }
  0x97   :  { %270 = vst [vmem:[%s526_s3 + $0x8] sm:$0xff] %v254_v41  ;;  %v242_v43 = vadd.f32 %v226_v42, %v131_v39 }
  0x98   :  { %v110_v44 = vpop.f32.mrf.mxu0  ;;  %v175_v45 = vpop.f32.mrf.mxu1 }
  0x99   :  { %v262_v46 = vadd.f32 %v457_v27, %v242_v43  ;;  %v219_v47 = vmul.f32 %v175_v45, %v110_v44 }
  0x9b   :  { %278 = vst [vmem:[%s526_s3 + $0x48] sm:$0xff] %v262_v46  ;;  %v235_v48 = vadd.f32 %v219_v47, %v110_v44 }
  0x9c   :  { %v134_v49 = vpop.f32.mrf.mxu2  ;;  %v199_v50 = vpop.f32.mrf.mxu3 }
  0x9d   :  { %v255_v51 = vadd.f32 %v457_v27, %v235_v48  ;;  %v227_v52 = vmul.f32 %v199_v50, %v134_v49 }
  0x9f   :  { %271 = vst [vmem:[%s526_s3 + $0x10] sm:$0xff] %v255_v51  ;;  %v243_v53 = vadd.f32 %v227_v52, %v134_v49 }
  0xa0   :  { %v113_v54 = vpop.f32.mrf.mxu0  ;;  %v178_v55 = vpop.f32.mrf.mxu1 }
  0xa1   :  { %v263_v56 = vadd.f32 %v457_v27, %v243_v53  ;;  %v220_v57 = vmul.f32 %v178_v55, %v113_v54 }
  0xa3   :  { %279 = vst [vmem:[%s526_s3 + $0x50] sm:$0xff] %v263_v56  ;;  %v236_v58 = vadd.f32 %v220_v57, %v113_v54 }
  0xa4   :  { %v137_v59 = vpop.f32.mrf.mxu2  ;;  %v202_v60 = vpop.f32.mrf.mxu3 }
  0xa5   :  { %v256_v61 = vadd.f32 %v457_v27, %v236_v58  ;;  %v228_v62 = vmul.f32 %v202_v60, %v137_v59 }
  0xa7   :  { %272 = vst [vmem:[%s526_s3 + $0x18] sm:$0xff] %v256_v61  ;;  %v244_v63 = vadd.f32 %v228_v62, %v137_v59 }
  0xa8   :  { %v116_v0 = vpop.f32.mrf.mxu0  ;;  %v181_v1 = vpop.f32.mrf.mxu1 }
  0xa9   :  { %v264_v2 = vadd.f32 %v457_v27, %v244_v63  ;;  %v221_v3 = vmul.f32 %v181_v1, %v116_v0 }
  0xab   :  { %280 = vst [vmem:[%s526_s3 + $0x58] sm:$0xff] %v264_v2  ;;  %v237_v4 = vadd.f32 %v221_v3, %v116_v0 }
  0xac   :  { %v140_v5 = vpop.f32.mrf.mxu2  ;;  %v205_v6 = vpop.f32.mrf.mxu3 }
  0xad   :  { %v257_v7 = vadd.f32 %v457_v27, %v237_v4  ;;  %v229_v8 = vmul.f32 %v205_v6, %v140_v5 }
  0xaf   :  { %273 = vst [vmem:[%s526_s3 + $0x20] sm:$0xff] %v257_v7  ;;  %v245_v9 = vadd.f32 %v229_v8, %v140_v5 }
  0xb0   :  { %v119_v10 = vpop.f32.mrf.mxu0  ;;  %v184_v11 = vpop.f32.mrf.mxu1 }
  0xb1   :  { %v265_v12 = vadd.f32 %v457_v27, %v245_v9  ;;  %v222_v13 = vmul.f32 %v184_v11, %v119_v10 }
  0xb3   :  { %281 = vst [vmem:[%s526_s3 + $0x60] sm:$0xff] %v265_v12  ;;  %v238_v14 = vadd.f32 %v222_v13, %v119_v10 }
  0xb4   :  { %v143_v15 = vpop.f32.mrf.mxu2  ;;  %v208_v16 = vpop.f32.mrf.mxu3 }
  0xb5   :  { %v258_v17 = vadd.f32 %v457_v27, %v238_v14  ;;  %v230_v18 = vmul.f32 %v208_v16, %v143_v15 }
  0xb7   :  { %274 = vst [vmem:[%s526_s3 + $0x28] sm:$0xff] %v258_v17  ;;  %v246_v19 = vadd.f32 %v230_v18, %v143_v15 }
  0xb8   :  { %v122_v20 = vpop.f32.mrf.mxu0  ;;  %v187_v21 = vpop.f32.mrf.mxu1 }
  0xb9   :  { %v266_v22 = vadd.f32 %v457_v27, %v246_v19  ;;  %v223_v23 = vmul.f32 %v187_v21, %v122_v20 }
  0xbb   :  { %282 = vst [vmem:[%s526_s3 + $0x68] sm:$0xff] %v266_v22  ;;  %v239_v24 = vadd.f32 %v223_v23, %v122_v20 }
  0xbc   :  { %v146_v25 = vpop.f32.mrf.mxu2  ;;  %v211_v26 = vpop.f32.mrf.mxu3 }
  0xbd   :  { %v259_v28 = vadd.f32 %v457_v27, %v239_v24  ;;  %v231_v29 = vmul.f32 %v211_v26, %v146_v25 }
  0xbf   :  { %275 = vst [vmem:[%s526_s3 + $0x30] sm:$0xff] %v259_v28  ;;  %v247_v30 = vadd.f32 %v231_v29, %v146_v25 }
  0xc0   :  { %v125_v31 = vpop.f32.mrf.mxu0  ;;  %v190_v32 = vpop.f32.mrf.mxu1 }
  0xc1   :  { %v267_v33 = vadd.f32 %v457_v27, %v247_v30  ;;  %v224_v34 = vmul.f32 %v190_v32, %v125_v31 }
  0xc3   :  { %283 = vst [vmem:[%s526_s3 + $0x70] sm:$0xff] %v267_v33  ;;  %v240_v35 = vadd.f32 %v224_v34, %v125_v31 }
  0xc4   :  { %v149_v36 = vpop.f32.mrf.mxu2  ;;  %v214_v37 = vpop.f32.mrf.mxu3 }
  0xc5   :  { %v260_v38 = vadd.f32 %v457_v27, %v240_v35  ;;  %v232_v39 = vmul.f32 %v214_v37, %v149_v36 }
  0xc7   :  { %276 = vst [vmem:[%s526_s3 + $0x38] sm:$0xff] %v260_v38  ;;  %v248_v40 = vadd.f32 %v232_v39, %v149_v36 }
  0xc9   :  { %v268_v41 = vadd.f32 %v457_v27, %v248_v40 }
  0xcb   :  { %284 = vst [vmem:[%s526_s3 + $0x78] sm:$0xff] %v268_v41 }

</bundles_post_ra>
